<compile_context>
chip_gen: v5e
topology: v5e:2x2
jax: 0.10.0
libtpu: 0.0.40
codegen_flags: <defaults>
</compile_context>

<pallas_src>
import functools

import jax
import jax.numpy as jnp
import numpy as np
from jax.experimental import pallas as pl
from jax.experimental.pallas import tpu as pltpu

LANE = 128
SUBLANE = 8


def _round_up(n, m):
    return ((n + m - 1) // m) * m


def _cdiv(a, b):
    return (a + b - 1) // b


# --------------------------------------------------------------------------- #
# Kernel
# --------------------------------------------------------------------------- #
def _trend_block_kernel(x_ref, w1_ref, b1_ref, w2_ref, b2_ref, w3_ref, b3_ref,
                        w4_ref, b4_ref, wout_ref, out_ref):
    # 4 fused Linear+ReLU layers (MXU matmul + VPU bias/relu), f32 accumulate.
    h = jnp.dot(x_ref[...], w1_ref[...], preferred_element_type=jnp.float32)
    h = jnp.maximum(h + b1_ref[...], 0.0)
    h = jnp.dot(h, w2_ref[...], preferred_element_type=jnp.float32)
    h = jnp.maximum(h + b2_ref[...], 0.0)
    h = jnp.dot(h, w3_ref[...], preferred_element_type=jnp.float32)
    h = jnp.maximum(h + b3_ref[...], 0.0)
    h = jnp.dot(h, w4_ref[...], preferred_element_type=jnp.float32)
    h = jnp.maximum(h + b4_ref[...], 0.0)

    # Fused (theta projection @ [trend bases]) -> one lane-dense output tile.
    out_ref[...] = jnp.dot(h, wout_ref[...],
                           preferred_element_type=jnp.float32).astype(out_ref.dtype)


# --------------------------------------------------------------------------- #
# One-time precompute (trend bases, fused W_out)
# --------------------------------------------------------------------------- #
def linear_space(backcast_length, forecast_length, is_forecast=True):
    horizon = forecast_length if is_forecast else backcast_length
    return np.arange(0, horizon) / horizon


def make_trend_basis(linspace, thetas_dim):
    # T[i, j] = linspace[j] ** i, shape (thetas_dim, horizon)
    return jnp.asarray(np.stack([linspace ** i for i in range(thetas_dim)], axis=0),
                       dtype=jnp.float32)


def prepare_params(params, backcast_length, forecast_length, thetas_dim):
    """Build fused theta->trend weight once (call outside the hot path)."""
    assert thetas_dim <= 4, "thetas_dim is too big."
    H = backcast_length + forecast_length
    H_pad = _round_up(H, LANE)

    tb = make_trend_basis(linear_space(backcast_length, forecast_length, False), thetas_dim)
    tf = make_trend_basis(linear_space(backcast_length, forecast_length, True), thetas_dim)
    basis = jnp.concatenate([tb, tf], axis=1)                     # (p, H)
    w_out = params["wt"].astype(jnp.float32) @ basis              # (units, H)
    w_out = jnp.pad(w_out, ((0, 0), (0, H_pad - H)))              # lane-pad output dim only

    return {
        "w1": params["w1"].astype(jnp.float32), "b1": params["b1"].astype(jnp.float32),
        "w2": params["w2"].astype(jnp.float32), "b2": params["b2"].astype(jnp.float32),
        "w3": params["w3"].astype(jnp.float32), "b3": params["b3"].astype(jnp.float32),
        "w4": params["w4"].astype(jnp.float32), "b4": params["b4"].astype(jnp.float32),
        "w_out": w_out,
    }


# --------------------------------------------------------------------------- #
# Forward wrapper
# --------------------------------------------------------------------------- #
@functools.partial(jax.jit,
                   static_argnames=("backcast_length", "forecast_length", "batch_tile"))
def trend_block_forward(x, prep, backcast_length, forecast_length, batch_tile=4096):
    # Glue: squeeze_last_dim
    if x.ndim == 3 and x.shape[-1] == 1:
        x = x[..., 0]
    x = x.astype(jnp.float32)
    B, K = x.shape
    H_pad = prep["w_out"].shape[1]

    # Divisor-style batch tiling: bounds padding waste to <8 rows per tile and
    # amortizes the ~0.35 us/step grid overhead with large tiles.
    B8 = _round_up(B, SUBLANE)
    ntiles = max(_cdiv(B8, batch_tile), 1)
    # Ensure >= 2 grid steps when there is enough work so the "parallel" batch
    # axis can feed both v7x TensorCores (harmless on v5e/v6e single-TC chips).
    if ntiles < 2 and B8 >= 2 * SUBLANE:
        ntiles = 2
    TB = _round_up(_cdiv(B8, ntiles), SUBLANE)
    B_pad = ntiles * TB

    # Only batch-pad; keep K=backcast_length unpadded (no 12.8x read inflation).
    x_pad = jnp.pad(x, ((0, B_pad - B), (0, 0)))

    def resident(arr):
        # Whole array, VMEM-resident across the grid; constant index_map so a
        # single buffer suffices (no double-buffering bookkeeping).
        return pl.BlockSpec(arr.shape, lambda i: (0, 0),
                            pipeline_mode=pl.Buffered(1))

    out = pl.pallas_call(
        _trend_block_kernel,
        out_shape=jax.ShapeDtypeStruct((B_pad, H_pad), jnp.float32),
        grid=(ntiles,),
        in_specs=[
            pl.BlockSpec((TB, K), lambda i: (i, 0)),   # x: tiled on batch, K unpadded
            resident(prep["w1"]), resident(prep["b1"]),
            resident(prep["w2"]), resident(prep["b2"]),
            resident(prep["w3"]), resident(prep["b3"]),
            resident(prep["w4"]), resident(prep["b4"]),
            resident(prep["w_out"]),
        ],
        out_specs=pl.BlockSpec((TB, H_pad), lambda i: (i, 0)),
        compiler_params=pltpu.CompilerParams(
            dimension_semantics=("parallel",),
            vmem_limit_bytes=32 * 1024 * 1024,
        ),
    )(x_pad, prep["w1"], prep["b1"], prep["w2"], prep["b2"],
      prep["w3"], prep["b3"], prep["w4"], prep["b4"], prep["w_out"])

    backcast = out[:B, :backcast_length]
    forecast = out[:B, backcast_length:backcast_length + forecast_length]
    return backcast, forecast


# --------------------------------------------------------------------------- #
# Parameter init (PyTorch Linear-style), reference, and test
# --------------------------------------------------------------------------- #
def init_params(key, units, thetas_dim, backcast_length):
    ks = jax.random.split(key, 9)

    def lin(kw, fan_in, fan_out):
        bound = 1.0 / np.sqrt(fan_in)
        return jax.random.uniform(kw, (fan_in, fan_out), jnp.float32, -bound, bound)

    def bias(kb, fan_in, fan_out):
        bound = 1.0 / np.sqrt(fan_in)
        return jax.random.uniform(kb, (1, fan_out), jnp.float32, -bound, bound)

    return {
        "w1": lin(ks[0], backcast_length, units), "b1": bias(ks[1], backcast_length, units),
        "w2": lin(ks[2], units, units),           "b2": bias(ks[3], units, units),
        "w3": lin(ks[4], units, units),           "b3": bias(ks[5], units, units),
        "w4": lin(ks[6], units, units),           "b4": bias(ks[7], units, units),
        # shared theta_b_fc == theta_f_fc, no bias
        "wt": lin(ks[8], units, thetas_dim),
    }


def reference_forward(x, params, backcast_length, forecast_length, thetas_dim):
    if x.ndim == 3 and x.shape[-1] == 1:
        x = x[..., 0]
    h = x.astype(jnp.float32)
    for i in (1, 2, 3, 4):
        h = jnp.maximum(h @ params[f"w{i}"] + params[f"b{i}"], 0.0)
    theta = h @ params["wt"]
    tb = make_trend_basis(linear_space(backcast_length, forecast_length, False), thetas_dim)
    tf = make_trend_basis(linear_space(backcast_length, forecast_length, True), thetas_dim)
    return theta @ tb, theta @ tf


if __name__ == "__main__":
    units = 32
    thetas_dim = 3          # must be <= 4 (polynomial degree)
    backcast_length = 10
    forecast_length = 5
    batch = 8

    key = jax.random.PRNGKey(0)
    kx, kp = jax.random.split(key)
    x = jax.random.normal(kx, (batch, backcast_length, 1), dtype=jnp.float32)
    params = init_params(kp, units, thetas_dim, backcast_length)

    # One-time precompute: fused theta->trend weight.
    prep = prepare_params(params, backcast_length, forecast_length, thetas_dim)

    backcast, forecast = trend_block_forward(
        x, prep, backcast_length, forecast_length)
    jax.block_until_ready((backcast, forecast))

    ref_back, ref_fore = reference_forward(
        x, params, backcast_length, forecast_length, thetas_dim)
    np.testing.assert_allclose(np.asarray(backcast), np.asarray(ref_back),
                               rtol=1e-4, atol=1e-5)
    np.testing.assert_allclose(np.asarray(forecast), np.asarray(ref_fore),
                               rtol=1e-4, atol=1e-5)

    print("KERNEL_OK")
</pallas_src>

<mosaic_0001>
module attributes {stable_mosaic.version = 11 : i64} {
  func.func @_trend_block_kernel(%arg0: i32, %arg1: memref<8x10xf32, #tpu.memory_space<vmem>>, %arg2: memref<10x32xf32, #tpu.memory_space<vmem>>, %arg3: memref<1x32xf32, #tpu.memory_space<vmem>>, %arg4: memref<32x32xf32, #tpu.memory_space<vmem>>, %arg5: memref<1x32xf32, #tpu.memory_space<vmem>>, %arg6: memref<32x32xf32, #tpu.memory_space<vmem>>, %arg7: memref<1x32xf32, #tpu.memory_space<vmem>>, %arg8: memref<32x32xf32, #tpu.memory_space<vmem>>, %arg9: memref<1x32xf32, #tpu.memory_space<vmem>>, %arg10: memref<32x128xf32, #tpu.memory_space<vmem>>, %arg11: memref<8x128xf32, #tpu.memory_space<vmem>>) attributes {dimension_semantics = [#tpu.dimension_semantics<parallel>], iteration_bounds = array<i64: 1>, scalar_prefetch = 0 : i64, scratch_operands = 0 : i64, tpu.core_type = #tpu.core_type<tc>, window_params = [{transform_indices = @transform_0, window_bounds = array<i64: 8, 10>}, {pipeline_mode = #tpu.pipeline_mode<synchronous>, transform_indices = @transform_1, window_bounds = array<i64: 10, 32>}, {pipeline_mode = #tpu.pipeline_mode<synchronous>, transform_indices = @transform_2, window_bounds = array<i64: 1, 32>}, {pipeline_mode = #tpu.pipeline_mode<synchronous>, transform_indices = @transform_3, window_bounds = array<i64: 32, 32>}, {pipeline_mode = #tpu.pipeline_mode<synchronous>, transform_indices = @transform_4, window_bounds = array<i64: 1, 32>}, {pipeline_mode = #tpu.pipeline_mode<synchronous>, transform_indices = @transform_5, window_bounds = array<i64: 32, 32>}, {pipeline_mode = #tpu.pipeline_mode<synchronous>, transform_indices = @transform_6, window_bounds = array<i64: 1, 32>}, {pipeline_mode = #tpu.pipeline_mode<synchronous>, transform_indices = @transform_7, window_bounds = array<i64: 32, 32>}, {pipeline_mode = #tpu.pipeline_mode<synchronous>, transform_indices = @transform_8, window_bounds = array<i64: 1, 32>}, {pipeline_mode = #tpu.pipeline_mode<synchronous>, transform_indices = @transform_9, window_bounds = array<i64: 32, 128>}, {transform_indices = @transform_10, window_bounds = array<i64: 8, 128>}]} {
    %c0 = arith.constant 0 : index
    %c0_0 = arith.constant 0 : index
    %0 = vector.load %arg1[%c0, %c0_0] : memref<8x10xf32, #tpu.memory_space<vmem>>, vector<8x10xf32>
    %c0_1 = arith.constant 0 : index
    %c0_2 = arith.constant 0 : index
    %1 = vector.load %arg2[%c0_1, %c0_2] : memref<10x32xf32, #tpu.memory_space<vmem>>, vector<10x32xf32>
    %cst = arith.constant dense<0.000000e+00> : vector<8x32xf32>
    %2 = tpu.matmul %0, %1, %cst {dimension_numbers = #tpu.dot_dimension_numbers<[1], [0], [0], [1], [0, 0, 1, 1], [], []>} : vector<8x10xf32>, vector<10x32xf32>, vector<8x32xf32> -> vector<8x32xf32>
    %c0_3 = arith.constant 0 : index
    %c0_4 = arith.constant 0 : index
    %3 = vector.load %arg3[%c0_3, %c0_4] : memref<1x32xf32, #tpu.memory_space<vmem>>, vector<1x32xf32>
    %4 = vector.broadcast %3 : vector<1x32xf32> to vector<8x32xf32>
    %5 = arith.addf %2, %4 : vector<8x32xf32>
    %cst_5 = arith.constant 0.000000e+00 : f32
    %6 = vector.broadcast %cst_5 : f32 to vector<8x32xf32>
    %7 = arith.maximumf %5, %6 : vector<8x32xf32>
    %c0_6 = arith.constant 0 : index
    %c0_7 = arith.constant 0 : index
    %8 = vector.load %arg4[%c0_6, %c0_7] : memref<32x32xf32, #tpu.memory_space<vmem>>, vector<32x32xf32>
    %cst_8 = arith.constant dense<0.000000e+00> : vector<8x32xf32>
    %9 = tpu.matmul %7, %8, %cst_8 {dimension_numbers = #tpu.dot_dimension_numbers<[1], [0], [0], [1], [0, 0, 1, 1], [], []>} : vector<8x32xf32>, vector<32x32xf32>, vector<8x32xf32> -> vector<8x32xf32>
    %c0_9 = arith.constant 0 : index
    %c0_10 = arith.constant 0 : index
    %10 = vector.load %arg5[%c0_9, %c0_10] : memref<1x32xf32, #tpu.memory_space<vmem>>, vector<1x32xf32>
    %11 = vector.broadcast %10 : vector<1x32xf32> to vector<8x32xf32>
    %12 = arith.addf %9, %11 : vector<8x32xf32>
    %cst_11 = arith.constant 0.000000e+00 : f32
    %13 = vector.broadcast %cst_11 : f32 to vector<8x32xf32>
    %14 = arith.maximumf %12, %13 : vector<8x32xf32>
    %c0_12 = arith.constant 0 : index
    %c0_13 = arith.constant 0 : index
    %15 = vector.load %arg6[%c0_12, %c0_13] : memref<32x32xf32, #tpu.memory_space<vmem>>, vector<32x32xf32>
    %cst_14 = arith.constant dense<0.000000e+00> : vector<8x32xf32>
    %16 = tpu.matmul %14, %15, %cst_14 {dimension_numbers = #tpu.dot_dimension_numbers<[1], [0], [0], [1], [0, 0, 1, 1], [], []>} : vector<8x32xf32>, vector<32x32xf32>, vector<8x32xf32> -> vector<8x32xf32>
    %c0_15 = arith.constant 0 : index
    %c0_16 = arith.constant 0 : index
    %17 = vector.load %arg7[%c0_15, %c0_16] : memref<1x32xf32, #tpu.memory_space<vmem>>, vector<1x32xf32>
    %18 = vector.broadcast %17 : vector<1x32xf32> to vector<8x32xf32>
    %19 = arith.addf %16, %18 : vector<8x32xf32>
    %cst_17 = arith.constant 0.000000e+00 : f32
    %20 = vector.broadcast %cst_17 : f32 to vector<8x32xf32>
    %21 = arith.maximumf %19, %20 : vector<8x32xf32>
    %c0_18 = arith.constant 0 : index
    %c0_19 = arith.constant 0 : index
    %22 = vector.load %arg8[%c0_18, %c0_19] : memref<32x32xf32, #tpu.memory_space<vmem>>, vector<32x32xf32>
    %cst_20 = arith.constant dense<0.000000e+00> : vector<8x32xf32>
    %23 = tpu.matmul %21, %22, %cst_20 {dimension_numbers = #tpu.dot_dimension_numbers<[1], [0], [0], [1], [0, 0, 1, 1], [], []>} : vector<8x32xf32>, vector<32x32xf32>, vector<8x32xf32> -> vector<8x32xf32>
    %c0_21 = arith.constant 0 : index
    %c0_22 = arith.constant 0 : index
    %24 = vector.load %arg9[%c0_21, %c0_22] : memref<1x32xf32, #tpu.memory_space<vmem>>, vector<1x32xf32>
    %25 = vector.broadcast %24 : vector<1x32xf32> to vector<8x32xf32>
    %26 = arith.addf %23, %25 : vector<8x32xf32>
    %cst_23 = arith.constant 0.000000e+00 : f32
    %27 = vector.broadcast %cst_23 : f32 to vector<8x32xf32>
    %28 = arith.maximumf %26, %27 : vector<8x32xf32>
    %c0_24 = arith.constant 0 : index
    %c0_25 = arith.constant 0 : index
    %29 = vector.load %arg10[%c0_24, %c0_25] : memref<32x128xf32, #tpu.memory_space<vmem>>, vector<32x128xf32>
    %cst_26 = arith.constant dense<0.000000e+00> : vector<8x128xf32>
    %30 = tpu.matmul %28, %29, %cst_26 {dimension_numbers = #tpu.dot_dimension_numbers<[1], [0], [0], [1], [0, 0, 1, 1], [], []>} : vector<8x32xf32>, vector<32x128xf32>, vector<8x128xf32> -> vector<8x128xf32>
    %c0_27 = arith.constant 0 : index
    %c0_28 = arith.constant 0 : index
    %31 = vector.load %arg11[%c0_27, %c0_28] : memref<8x128xf32, #tpu.memory_space<vmem>>, vector<8x128xf32>
    tpu.vector_store %arg11[%c0_27, %c0_28], %30 {strides = array<i32>} : memref<8x128xf32, #tpu.memory_space<vmem>>, vector<8x128xf32>,
    return
  }
  func.func @transform_0(%arg0: i32) -> (i32, i32) {
    %c0_i32 = arith.constant 0 : i32
    %c0_i32_0 = arith.constant 0 : i32
    return %arg0, %c0_i32 : i32, i32
  }
  func.func @transform_1(%arg0: i32) -> (i32, i32) {
    %c0_i32 = arith.constant 0 : i32
    %c0_i32_0 = arith.constant 0 : i32
    %c0_i32_1 = arith.constant 0 : i32
    return %c0_i32, %c0_i32_0 : i32, i32
  }
  func.func @transform_2(%arg0: i32) -> (i32, i32) {
    %c0_i32 = arith.constant 0 : i32
    %c0_i32_0 = arith.constant 0 : i32
    %c0_i32_1 = arith.constant 0 : i32
    return %c0_i32, %c0_i32_0 : i32, i32
  }
  func.func @transform_3(%arg0: i32) -> (i32, i32) {
    %c0_i32 = arith.constant 0 : i32
    %c0_i32_0 = arith.constant 0 : i32
    %c0_i32_1 = arith.constant 0 : i32
    return %c0_i32, %c0_i32_0 : i32, i32
  }
  func.func @transform_4(%arg0: i32) -> (i32, i32) {
    %c0_i32 = arith.constant 0 : i32
    %c0_i32_0 = arith.constant 0 : i32
    %c0_i32_1 = arith.constant 0 : i32
    return %c0_i32, %c0_i32_0 : i32, i32
  }
  func.func @transform_5(%arg0: i32) -> (i32, i32) {
    %c0_i32 = arith.constant 0 : i32
    %c0_i32_0 = arith.constant 0 : i32
    %c0_i32_1 = arith.constant 0 : i32
    return %c0_i32, %c0_i32_0 : i32, i32
  }
  func.func @transform_6(%arg0: i32) -> (i32, i32) {
    %c0_i32 = arith.constant 0 : i32
    %c0_i32_0 = arith.constant 0 : i32
    %c0_i32_1 = arith.constant 0 : i32
    return %c0_i32, %c0_i32_0 : i32, i32
  }
  func.func @transform_7(%arg0: i32) -> (i32, i32) {
    %c0_i32 = arith.constant 0 : i32
    %c0_i32_0 = arith.constant 0 : i32
    %c0_i32_1 = arith.constant 0 : i32
    return %c0_i32, %c0_i32_0 : i32, i32
  }
  func.func @transform_8(%arg0: i32) -> (i32, i32) {
    %c0_i32 = arith.constant 0 : i32
    %c0_i32_0 = arith.constant 0 : i32
    %c0_i32_1 = arith.constant 0 : i32
    return %c0_i32, %c0_i32_0 : i32, i32
  }
  func.func @transform_9(%arg0: i32) -> (i32, i32) {
    %c0_i32 = arith.constant 0 : i32
    %c0_i32_0 = arith.constant 0 : i32
    %c0_i32_1 = arith.constant 0 : i32
    return %c0_i32, %c0_i32_0 : i32, i32
  }
  func.func @transform_10(%arg0: i32) -> (i32, i32) {
    %c0_i32 = arith.constant 0 : i32
    %c0_i32_0 = arith.constant 0 : i32
    return %arg0, %c0_i32 : i32, i32
  }
}

</mosaic_0001>

<bundles_post_ra>
// kernel: trend_block_forward.1
= control target key start
LH: loop header
LB: loop body
LE: loop exit
PB: predicated region body
PF: predicated region fallthrough
CT: control target
= control target key end

     0   :  { %15 = vsyncpa [#allocation3], 0  ;;  %s581_s0 = inlined_call_operand.hbm [shape: f32[8,10], index: 0, kind: input, shape index: {}]   ;;  %s582_s1 = inlined_call_operand.hbm [shape: f32[10,32], index: 1, kind: input, shape index: {}]   ;;  %s583_s2 = inlined_call_operand.vmem [shape: f32[1,32], index: 2, kind: input, shape index: {}]   ;;  %s584_s3 = inlined_call_operand.hbm [shape: f32[32,32], index: 3, kind: input, shape index: {}]   ;;  %s585_s4 = inlined_call_operand.vmem [shape: f32[1,32], index: 4, kind: input, shape index: {}]   ;;  %s586_s5 = inlined_call_operand.hbm [shape: f32[32,32], index: 5, kind: input, shape index: {}]   ;;  %s587_s6 = inlined_call_operand.vmem [shape: f32[1,32], index: 6, kind: input, shape index: {}]   ;;  %s588_s7 = inlined_call_operand.hbm [shape: f32[32,32], index: 7, kind: input, shape index: {}]   ;;  %s589_s8 = inlined_call_operand.vmem [shape: f32[1,32], index: 8, kind: input, shape index: {}]   ;;  %s590_s9 = inlined_call_operand.hbm [shape: f32[32,128], index: 9, kind: input, shape index: {}]   ;;  %s591_s10 = inlined_call_operand.vmem [shape: f32[8,128], index: 10, kind: output, shape index: {}]  }
   0x1   :  { %16 = vsyncpa [#allocation5], 0 }
   0x2   :  { %17 = vsyncpa [#allocation8], 0  ;;  %s34_s15 = sshll.u32 %s582_s1, 4  ;;  %s35_s15 = int_to_ptr.hbm [resolvable:$true] %s34_s15 }
   0x3   :  { %18 = vsyncpa [#allocation11], 0  ;;  %s466_s16 = smov [#allocation4]   ;;  %s64_s20 = sshll.u32 %s586_s5, 4  ;;  %s65_s20 = int_to_ptr.hbm [resolvable:$true] %s64_s20 }
   0x4   :  { %s36_s17 = sshll.u32 %s466_s16, 4  ;;  %s467_s21 = smov 128   ;;  %s37_s17 = int_to_ptr.vmem [resolvable:$true] %s36_s17 }
   0x5   :  { %s468_s22 = smov 8   ;;  %s469_s23 = smov [#allocation7]  }
   0x6   :  { %42 = dma.hbm_to_vmem [thread:$0]  %s35_s15, 256, %s37_s17, [#allocation5], %s467_s21, %s467_s21, %s468_s22  }
   0x7   :  { %s66_s24 = sshll.u32 %s469_s23, 4  ;;  %s24_s26 = sshll.u32 %s581_s0, 4  ;;  %s67_s24 = int_to_ptr.vmem [resolvable:$true] %s66_s24  ;;  %s25_s26 = int_to_ptr.hbm [resolvable:$true] %s24_s26 }
   0x8   :  { %72 = dma.hbm_to_vmem [thread:$0]  %s65_s20, 512, %s67_s24, [#allocation8], %s467_s21, %s467_s21, %s468_s22  }
   0x9   :  { %s49_s28 = sshll.u32 %s584_s3, 4  ;;  %s470_s29 = smov [#allocation2]   ;;  %s50_s28 = int_to_ptr.hbm [resolvable:$true] %s49_s28 }
   0xa   :  { %s26_s30 = sshll.u32 %s470_s29, 4  ;;  %s471_s11 = smov [#allocation6]   ;;  %s27_s30 = int_to_ptr.vmem [resolvable:$true] %s26_s30 }
   0xb   :  { %29 = dma.hbm_to_vmem [thread:$0]  %s25_s26, 128, %s27_s30, [#allocation3]  }
   0xc   :  { %s51_s12 = sshll.u32 %s471_s11, 4  ;;  %s79_s0 = sshll.u32 %s588_s7, 4  ;;  %s52_s12 = int_to_ptr.vmem [resolvable:$true] %s51_s12  ;;  %s80_s0 = int_to_ptr.hbm [resolvable:$true] %s79_s0 }
   0xd   :  { %57 = dma.hbm_to_vmem [thread:$0]  %s50_s28, 512, %s52_s12, [#allocation5], %s467_s21, %s467_s21, %s468_s22  }
   0xe   :  { %s94_s3 = sshll.u32 %s590_s9, 4  ;;  %s472_s17 = smov [#allocation9]   ;;  %s95_s3 = int_to_ptr.hbm [resolvable:$true] %s94_s3 }
   0xf   :  { %s81_s18 = sshll.u32 %s472_s17, 4  ;;  %s473_s19 = smov [#allocation10]   ;;  %s82_s18 = int_to_ptr.vmem [resolvable:$true] %s81_s18 }
  0x10   :  { %87 = dma.hbm_to_vmem [thread:$0]  %s80_s0, 512, %s82_s18, [#allocation8], %s467_s21, %s467_s21, %s468_s22  }
  0x11   :  { %s96_s7 = sshll.u32 %s473_s19, 4  ;;  %s97_s7 = int_to_ptr.vmem [resolvable:$true] %s96_s7 }
  0x12   :  { %102 = dma.hbm_to_vmem [thread:$0]  %s95_s3, 512, %s97_s7, [#allocation11], %s467_s21, %s467_s21, %s468_s22  }
  0x13   :  { %458 = dma.done.wait [#allocation3], 128  }
  0x14   :  { %459 = vsyncadd [#allocation3], 4294967168 }
  0x15   :  { %460 = dma.done.wait [#allocation5], 768  }
  0x16   :  { %461 = vsyncadd [#allocation5], 4294966528 }
  0x17   :  { %462 = dma.done.wait [#allocation8], 1024  }
  0x18   :  { %463 = vsyncadd [#allocation8], 4294966272 }
  0x19   :  { %464 = dma.done.wait [#allocation11], 512  }
  0x1a   :  { %465 = vsyncadd [#allocation11], 4294966784  ;;  %vm138_vm0 = vcmask 1041408   ;;  %v129_v0 = vld [vmem:[#allocation4 + $0x8] sm:$0x3]  ;;  %v128_v1 = vld [vmem:[#allocation4] sm:$0xff] }
  0x1b   :  { %296 = vmatpush.msk.msra.mxu0 %vm138_vm0, %v129_v0  ;;  %v127_v2 = vld [vmem:[#allocation2] sm:$0xff]  ;;  %vm134_vm1 = vcmask 80896   ;;  %v166_v3 = vld [vmem:[#allocation6 + $0x18] sm:$0xff]  ;;  %v165_v4 = vld [vmem:[#allocation6 + $0x10] sm:$0xff]  ;;  %vm171_vm2 = vcmask 261120  }
  0x1c   :  { %187 = vmatpush.msra.mxu1 %v166_v3  ;;  %v164_v5 = vld [vmem:[#allocation6 + $0x8] sm:$0xff]  ;;  %v163_v6 = vld [vmem:[#allocation6] sm:$0xff]  ;;  %v199_v7 = vld [vmem:[#allocation7 + $0x18] sm:$0xff] }
  0x1d   :  { %157 = vmatpush.msra.mxu0 %v128_v1  ;;  %219 = vmatpush.msra.mxu2 %v199_v7  ;;  %v310_v8 = vld [vmem:[%s583_s2] ss:$0 sm:$0xff]  ;;  %v198_v12 = vld [vmem:[#allocation7 + $0x10] sm:$0xff]  ;;  %v196_v14 = vld [vmem:[#allocation7] sm:$0xff] }
  0x1e   :  { %297 = vmatmul.msk.f32.vlgmr.msra.gmra.mxu0 %vm134_vm1, %v127_v2  ;;  %188 = vmatpush.msra.mxu1 %v165_v4  ;;  %v197_v13 = vld [vmem:[#allocation7 + $0x8] sm:$0xff]  ;;  %v231_v15 = vld [vmem:[#allocation9 + $0x18] sm:$0xff]  ;;  %v230_v20 = vld [vmem:[#allocation9 + $0x10] sm:$0xff] }
  0x1f   :  { %220 = vmatpush.msra.mxu2 %v198_v12  ;;  %251 = vmatpush.msra.mxu3 %v231_v15  ;;  %v311_v16 = vld [vmem:[%s585_s4] ss:$0 sm:$0xff]  ;;  %v228_v22 = vld [vmem:[#allocation9] sm:$0xff]  ;;  %v263_v23 = vld [vmem:[#allocation10 + $0x18] sm:$0xff] }
  0x20   :  { %189 = vmatpush.msra.mxu1 %v164_v5  ;;  %v229_v21 = vld [vmem:[#allocation9 + $0x8] sm:$0xff]  ;;  %v262_v24 = vld [vmem:[#allocation10 + $0x10] sm:$0xff]  ;;  %279 = vmatpush.msrb.mxu0 %v263_v23  ;;  %v260_v30 = vld [vmem:[#allocation10] sm:$0xff] }
  0x21   :  { %221 = vmatpush.msra.mxu2 %v197_v13  ;;  %252 = vmatpush.msra.mxu3 %v230_v20  ;;  %v312_v25 = vld [vmem:[%s587_s6] ss:$0 sm:$0xff] }
  0x22   :  { %190 = vmatpush.msra.mxu1 %v163_v6  ;;  %280 = vmatpush.msrb.mxu0 %v262_v24  ;;  %v261_v29 = vld [vmem:[#allocation10 + $0x8] sm:$0xff] }
  0x23   :  { %222 = vmatpush.msra.mxu2 %v196_v14  ;;  %253 = vmatpush.msra.mxu3 %v229_v21  ;;  %v313_v31 = vld [vmem:[%s589_s8] ss:$0 sm:$0xff] }
  0x24   :  { %281 = vmatpush.msrb.mxu0 %v261_v29 }
  0x25   :  { %254 = vmatpush.msra.mxu3 %v228_v22 }
  0x26   :  { %282 = vmatpush.msrb.mxu0 %v260_v30 }
  0x9b   :  { %v159_v9 = vpop.f32.mrf.mxu0 }
  0x9c   :  { %v160_v10 = vadd.f32 %v310_v8, %v159_v9 }
  0x9e   :  { %v162_v11 = vmax.f32 %v160_v10, 0.0 }
  0xa0   :  { %298 = vmatmul.msk.f32.vlgmr.msra.gmra.mxu1 %vm171_vm2, %v162_v11 }
 0x11d   :  { %v192_v17 = vpop.f32.mrf.mxu1 }
 0x11e   :  { %v193_v18 = vadd.f32 %v311_v16, %v192_v17 }
 0x120   :  { %v195_v19 = vmax.f32 %v193_v18, 0.0 }
 0x122   :  { %299 = vmatmul.msk.f32.vlgmr.msra.gmra.mxu2 %vm171_vm2, %v195_v19 }
 0x1a5   :  { %v224_v26 = vpop.f32.mrf.mxu2 }
 0x1a6   :  { %v225_v27 = vadd.f32 %v312_v25, %v224_v26 }
 0x1a8   :  { %v227_v28 = vmax.f32 %v225_v27, 0.0 }
 0x1aa   :  { %300 = vmatmul.msk.f32.vlgmr.msra.gmra.mxu3 %vm171_vm2, %v227_v28 }
 0x22d   :  { %v256_v32 = vpop.f32.mrf.mxu3 }
 0x22e   :  { %v257_v33 = vadd.f32 %v313_v31, %v256_v32 }
 0x230   :  { %v259_v34 = vmax.f32 %v257_v33, 0.0 }
 0x232   :  { %301 = vmatmul.msk.f32.vlgmr.msrb.gmra.mxu0 %vm171_vm2, %v259_v34 }
 0x2af   :  { %v284_v35 = vpop.f32.mrf.mxu0 }
 0x2b0   :  { %287 = vst [vmem:[%s591_s10] sm:$0xff] %v284_v35 }
 0x2b1   :  { %292 = vsyncpa [#allocation3], 1 }
 0x2b2   :  { %293 = vsyncpa [#allocation5], 1 }
 0x2b3   :  { %294 = vsyncpa [#allocation8], 1 }
 0x2b4   :  { %295 = vsyncpa [#allocation11], 1 }

</bundles_post_ra>
